<compile_context>
chip_gen: v6e
topology: v6e:2x2x1
jax: 0.10.0
libtpu: 0.0.40
codegen_flags: <defaults>
</compile_context>

<pallas_src>
import functools

import jax
import jax.numpy as jnp
from jax import lax
from jax.experimental import pallas as pl
from jax.experimental.pallas import tpu as pltpu


def _round_up(x, m):
    return ((x + m - 1) // m) * m


def _vmem_capacity_bytes():
    try:
        return int(pltpu.get_tpu_info().vmem_capacity_bytes)
    except Exception:
        return 64 * 1024 * 1024  # conservative fallback: v7x per-TensorCore VMEM


def _pick_tm(batch, n_pad, k_pad, budget_bytes):
    """Pick the largest row-tile tm (multiple of 8) that
       (a) leaves >= 2 row tiles once batch >= 16 (megacore sharding on v7x), and
       (b) fits VMEM: single-buffered resident RHS + double-buffered LHS tile
           + double-buffered f32 output tile."""
    rhs_bytes = n_pad * k_pad * 2  # bf16 resident RHS, Buffered(1) -> one copy
    for cand in (1024, 512, 256, 128, 64, 32, 16, 8):
        if cand > 8 and 2 * cand > max(batch, 16):
            continue  # would collapse to a single row tile -> one idle TC on v7x
        footprint = (rhs_bytes
                     + 2 * cand * k_pad * 2    # LHS row tile, double-buffered
                     + 2 * cand * n_pad * 4)   # f32 output tile, double-buffered
        if footprint > budget_bytes:
            continue
        return cand, footprint
    cand = 8  # minimum legal sublane tile; may still exceed budget (see K-tiling TODO)
    footprint = rhs_bytes + 2 * cand * k_pad * 2 + 2 * cand * n_pad * 4
    return cand, footprint


def _extended_product_kernel(src_ref, cat_ref, out_ref, *, batch):
    """One grid step = one lane-dense row tile of the output.

    src_ref: (tm, K_pad)    bf16 LHS row tile (auto-pipelined; no in-kernel slice)
    cat_ref: (N_pad, K_pad) bf16 resident RHS = [trg; src], single-buffered
    out_ref: (tm, N_pad)    f32 output row tile (N_pad multiple of 128 ->
                            one unmasked, lane-dense store)
    """
    tm, n_pad = out_ref.shape

    # Single MXU contraction over the shared lane dim: src @ cat.T.
    acc = lax.dot_general(src_ref[...], cat_ref[...],
                          (((1,), (1,)), ((), ())),
                          preferred_element_type=jnp.float32)

    # Fuse the -inf mask at global position (r, batch + r) into the store.
    row = pl.program_id(0) * tm + lax.broadcasted_iota(jnp.int32, (tm, n_pad), 0)
    col = lax.broadcasted_iota(jnp.int32, (tm, n_pad), 1)
    out_ref[...] = jnp.where(col == batch + row, -jnp.inf, acc)


def extended_product_pallas(trg_embds, src_embds, subspaces,
                            compute_dtype=jnp.bfloat16):
    """Pallas equivalent of ExtendedProduct.forward (val=False, trg is B x D).

    trg_embds / src_embds: dicts {modality: (B, D) array}
    subspaces: list of modality keys
    returns: (B, 2B) float32 similarity matrix with -inf at (i, B + i)

    Note: inputs are cast to `compute_dtype` (default bf16, MXU-native);
    accumulation is f32. Pass compute_dtype=jnp.float32 for strict f32 parity.
    """
    # Fold the modality loop into one contraction dim: (B, M, D) -> (B, M*D).
    src_mat = jnp.stack([src_embds[k] for k in subspaces], axis=1)
    trg_mat = jnp.stack([trg_embds[k] for k in subspaces], axis=1)
    B, M, D = src_mat.shape
    K = M * D
    src_mat = src_mat.reshape(B, K).astype(compute_dtype)
    trg_mat = trg_mat.reshape(B, K).astype(compute_dtype)

    # Pre-concatenate the RHS once: [trg; src] -> (2B, K).
    cat_mat = jnp.concatenate([trg_mat, src_mat], axis=0)

    n_pad = _round_up(2 * B, 128)   # lane-dense output columns
    k_pad = _round_up(K, 128)       # dense contraction loads

    vmem_cap = _vmem_capacity_bytes()
    tm, footprint = _pick_tm(B, n_pad, k_pad, int(0.8 * vmem_cap))
    b_rows_pad = _round_up(B, tm)

    src_p = jnp.pad(src_mat, ((0, b_rows_pad - B), (0, k_pad - K)))
    cat_p = jnp.pad(cat_mat, ((0, n_pad - 2 * B), (0, k_pad - K)))

    # Scoped-VMEM limit from the real footprint (+ headroom), not the default.
    vmem_limit = int(min(max(footprint + (4 << 20), 32 << 20),
                         int(0.9 * vmem_cap)))

    grid_spec = pltpu.PrefetchScalarGridSpec(
        num_scalar_prefetch=0,
        grid=(b_rows_pad // tm,),
        in_specs=[
            # LHS row tile — auto-pipelined; no in-kernel dynamic slice needed.
            pl.BlockSpec((tm, k_pad), lambda i: (i, 0)),
            # Resident RHS — constant index_map, so a second pipeline buffer
            # would never be used: single-buffer it to halve its VMEM.
            pl.BlockSpec((n_pad, k_pad), lambda i: (0, 0),
                         pipeline_mode=pl.Buffered(1)),
        ],
        out_specs=pl.BlockSpec((tm, n_pad), lambda i: (i, 0)),
    )

    out = pl.pallas_call(
        functools.partial(_extended_product_kernel, batch=B),
        out_shape=jax.ShapeDtypeStruct((b_rows_pad, n_pad), jnp.float32),
        grid_spec=grid_spec,
        compiler_params=pltpu.CompilerParams(
            dimension_semantics=("parallel",),  # megacore row sharding on v7x
            vmem_limit_bytes=vmem_limit,
        ),
    )(src_p, cat_p)

    # Contiguous slice (no concat): columns [0, 2B) already hold [trg | src].
    return out[:B, :2 * B]


def extended_product_ref(trg_embds, src_embds, subspaces,
                         compute_dtype=jnp.float32):
    """Pure-JAX reference mirroring the PyTorch code (2-D trg path)."""
    B = src_embds[subspaces[0]].shape[0]
    sims = jnp.zeros((B, 2 * B), dtype=jnp.float32)
    for k in subspaces:
        s = src_embds[k].astype(compute_dtype)
        t = trg_embds[k].astype(compute_dtype)
        cat = jnp.concatenate([t, s], axis=0)
        sims = sims + jnp.dot(s, cat.T, preferred_element_type=jnp.float32)
    r = jnp.arange(B)
    return sims.at[r, B + r].set(-jnp.inf)


if __name__ == "__main__":
    B, D = 8, 32
    subspaces = ["attr0", "attr1"]

    key = jax.random.PRNGKey(0)
    keys = jax.random.split(key, 2 * len(subspaces))
    trg_embds = {}
    src_embds = {}
    for i, name in enumerate(subspaces):
        trg_embds[name] = jax.random.normal(keys[2 * i], (B, D), jnp.float32)
        src_embds[name] = jax.random.normal(keys[2 * i + 1], (B, D), jnp.float32)

    sims = jax.block_until_ready(
        extended_product_pallas(trg_embds, src_embds, subspaces))

    assert sims.shape == (B, 2 * B)

    # -inf mask placed at (i, B + i).
    ridx = jnp.arange(B)
    assert bool(jnp.all(jnp.isneginf(sims[ridx, B + ridx])))

    # Tight check vs a reference computed at the same (bf16) input precision,
    # loose sanity check vs the full-f32 reference (error bounded by bf16 cast).
    ref_bf16 = extended_product_ref(trg_embds, src_embds, subspaces,
                                    compute_dtype=jnp.bfloat16)
    ref_f32 = extended_product_ref(trg_embds, src_embds, subspaces,
                                   compute_dtype=jnp.float32)

    finite = jnp.isfinite(ref_f32)
    assert bool(jnp.all(finite == jnp.isfinite(sims))), "mask placement mismatch"

    sims_f = jnp.where(finite, sims, 0.0)
    assert bool(jnp.allclose(sims_f, jnp.where(finite, ref_bf16, 0.0),
                             atol=5e-3, rtol=5e-3)), "mismatch vs bf16 reference"
    assert bool(jnp.allclose(sims_f, jnp.where(finite, ref_f32, 0.0),
                             atol=5e-1, rtol=5e-2)), "mismatch vs f32 reference"

    print("KERNEL_OK")
</pallas_src>

<mosaic_0001>
module attributes {stable_mosaic.version = 11 : i64} {
  func.func @_extended_product_kernel(%arg0: i32, %arg1: memref<8x128xbf16, #tpu.memory_space<vmem>>, %arg2: memref<128x128xbf16, #tpu.memory_space<vmem>>, %arg3: memref<8x128xf32, #tpu.memory_space<vmem>>) attributes {dimension_semantics = [#tpu.dimension_semantics<parallel>], iteration_bounds = array<i64: 1>, scalar_prefetch = 0 : i64, scratch_operands = 0 : i64, tpu.core_type = #tpu.core_type<tc>, window_params = [{transform_indices = @transform_0, window_bounds = array<i64: 8, 128>}, {pipeline_mode = #tpu.pipeline_mode<synchronous>, transform_indices = @transform_1, window_bounds = array<i64: 128, 128>}, {transform_indices = @transform_2, window_bounds = array<i64: 8, 128>}]} {
    %c0 = arith.constant 0 : index
    %c0_0 = arith.constant 0 : index
    %0 = vector.load %arg1[%c0, %c0_0] : memref<8x128xbf16, #tpu.memory_space<vmem>>, vector<8x128xbf16>
    %c0_1 = arith.constant 0 : index
    %c0_2 = arith.constant 0 : index
    %1 = vector.load %arg2[%c0_1, %c0_2] : memref<128x128xbf16, #tpu.memory_space<vmem>>, vector<128x128xbf16>
    %cst = arith.constant dense<0.000000e+00> : vector<8x128xf32>
    %2 = tpu.matmul %0, %1, %cst {dimension_numbers = #tpu.dot_dimension_numbers<[1], [1], [0], [0], [0, 0, 1, 0], [], []>} : vector<8x128xbf16>, vector<128x128xbf16>, vector<8x128xf32> -> vector<8x128xf32>
    %c8_i32 = arith.constant 8 : i32
    %3 = arith.muli %arg0, %c8_i32 : i32
    %4 = tpu.iota {dimensions = array<i32: 0>} : vector<8x128xi32>
    %5 = vector.broadcast %3 : i32 to vector<8x128xi32>
    %6 = arith.addi %5, %4 : vector<8x128xi32>
    %7 = tpu.iota {dimensions = array<i32: 1>} : vector<8x128xi32>
    %c8_i32_3 = arith.constant 8 : i32
    %8 = vector.broadcast %c8_i32_3 : i32 to vector<8x128xi32>
    %9 = arith.addi %8, %6 : vector<8x128xi32>
    %10 = arith.cmpi eq, %7, %9 : vector<8x128xi32>
    %cst_4 = arith.constant 0xFF800000 : f32
    %11 = vector.broadcast %cst_4 : f32 to vector<8x128xf32>
    %12 = arith.select %10, %11, %2 : vector<8x128xi1>, vector<8x128xf32>
    %c0_5 = arith.constant 0 : index
    %c0_6 = arith.constant 0 : index
    %13 = vector.load %arg3[%c0_5, %c0_6] : memref<8x128xf32, #tpu.memory_space<vmem>>, vector<8x128xf32>
    tpu.vector_store %arg3[%c0_5, %c0_6], %12 {strides = array<i32>} : memref<8x128xf32, #tpu.memory_space<vmem>>, vector<8x128xf32>,
    return
  }
  func.func @transform_0(%arg0: i32) -> (i32, i32) {
    %c0_i32 = arith.constant 0 : i32
    %c0_i32_0 = arith.constant 0 : i32
    return %arg0, %c0_i32 : i32, i32
  }
  func.func @transform_1(%arg0: i32) -> (i32, i32) {
    %c0_i32 = arith.constant 0 : i32
    %c0_i32_0 = arith.constant 0 : i32
    %c0_i32_1 = arith.constant 0 : i32
    return %c0_i32, %c0_i32_0 : i32, i32
  }
  func.func @transform_2(%arg0: i32) -> (i32, i32) {
    %c0_i32 = arith.constant 0 : i32
    %c0_i32_0 = arith.constant 0 : i32
    return %arg0, %c0_i32 : i32, i32
  }
}

</mosaic_0001>

<bundles_post_ra>
// kernel: tpu_custom_call.1
= control target key start
LH: loop header
LB: loop body
LE: loop exit
PB: predicated region body
PF: predicated region fallthrough
CT: control target
= control target key end

     0   :  { %7 = vsyncpa [#allocation3], 0  ;;  %s320_s0 = inlined_call_operand.hbm [shape: bf16[8,128], index: 0, kind: input, shape index: {}]   ;;  %s321_s1 = inlined_call_operand.hbm [shape: bf16[128,128], index: 1, kind: input, shape index: {}]   ;;  %s322_s2 = inlined_call_operand.hbm [shape: f32[8,128], index: 2, kind: output, shape index: {}]  }
   0x1   :  { %8 = vsyncpa [#allocation6], 0 }
   0x2   :  { %9 = vsyncpa [#allocation4], 0  ;;  %s289_s9 = smov [#allocation2]   ;;  %s290_s11 = smov [#allocation5]  }
   0x3   :  { %s16_s10 = sshll.u32 %s289_s9, 4  ;;  %s25_s12 = sshll.u32 %s290_s11, 4  ;;  %s17_s10 = int_to_ptr.vmem [resolvable:$true] %s16_s10  ;;  %s26_s12 = int_to_ptr.vmem [resolvable:$true] %s25_s12 }
   0x4   :  { %s231_s13 = scalar_lea.vmem %s17_s10, 64  ;;  %p236_p1 = scmp.lt.s32.totalorder %s17_s10, %s17_s10 }
   0x5   :  { %p232_p0 = scmp.ne.s32.totalorder %s17_s10, %s231_s13  ;;  %p237_p2 = scmp.lt.s32.totalorder %s231_s13, %s231_s13 }
   0x7   :  { %p238_p3 = por %p237_p2, %p236_p1 }
   0x9   :  { %p239_p4 = pnand %p238_p3, %p232_p0 }
   0xb   :  { %242 = shalt.err (!%p239_p4)
}
   0xc   :  { %19 = dma.hbm_to_vmem [thread:$0]  %s320_s0, 64, %s17_s10, [#allocation3]  }
   0xd   :  { %s251_s16 = scalar_lea.vmem %s26_s12, 1024  ;;  %p256_p6 = scmp.lt.s32.totalorder %s26_s12, %s26_s12 }
   0xe   :  { %p252_p5 = scmp.ne.s32.totalorder %s26_s12, %s251_s16  ;;  %p257_p7 = scmp.lt.s32.totalorder %s251_s16, %s251_s16 }
  0x10   :  { %p258_p8 = por %p257_p7, %p256_p6 }
  0x12   :  { %p259_p9 = pnand %p258_p8, %p252_p5 }
  0x14   :  { %262 = shalt.err (!%p259_p9)
}
  0x15   :  { %s291_s17 = smov 64   ;;  %s292_s18 = smov 4  }
  0x16   :  { %31 = dma.hbm_to_vmem [thread:$0]  %s321_s1, 1024, %s26_s12, [#allocation6], %s291_s17, %s291_s17, %s292_s18  }
  0x17   :  { %283 = dma.done.wait [#allocation3], 64  }
  0x18   :  { %284 = vsyncadd [#allocation3], 4294967232 }
  0x19   :  { %285 = dma.done.wait [#allocation6], 1024  }
  0x1a   :  { %286 = vsyncadd [#allocation6], 4294966272  ;;  %v293_v0 = vmov 0.0   ;;  %vm294_vm0 = vmmov 0   ;;  %v215_v1 = vld [vmem:[#allocation5 + $0x38] sm:$0xff]   ;;  %v216_v2 = vld [vmem:[#allocation5 + $0x30] sm:$0xff]   ;;  %v145_v10 = vlaneseq }
  0x1b   :  { %188 = vmatprep.subr.bf16.mxu0 %v293_v0  ;;  %204 = vmatprep.mubr.msk.bf16.mxu0 %vm294_vm0, %v293_v0  ;;  %v217_v3 = vld [vmem:[#allocation5 + $0x28] sm:$0xff]   ;;  %v218_v4 = vld [vmem:[#allocation5 + $0x20] sm:$0xff]   ;;  %v219_v5 = vld [vmem:[#allocation5 + $0x18] sm:$0xff]   ;;  %s295_s0 = smov [#allocation7]  }
  0x1c   :  { %189 = vmatpush3.bf16.xpose.msra.mxu0 %v215_v1  ;;  %v220_v6 = vld [vmem:[#allocation5 + $0x10] sm:$0xff]   ;;  %v221_v7 = vld [vmem:[#allocation5 + $0x8] sm:$0xff]   ;;  %v222_v8 = vld [vmem:[#allocation5] sm:$0xff]   ;;  %v146_v11 = vshrl.u32 %v145_v10, 7  ;;  %v150_v12 = vand.u32 127, %v145_v10  ;;  %s161_s1 = sshll.u32 %s295_s0, 4  ;;  %s162_s1 = int_to_ptr.vmem [resolvable:$true] %s161_s1 }
  0x1d   :  { %190 = vmatprep.subr.bf16.mxu0 %v293_v0  ;;  %v39_v9 = vld [vmem:[#allocation2] sm:$0xf]  ;;  %s263_s21 = scalar_lea.vmem %s162_s1, 128  ;;  %p268_p11 = scmp.lt.s32.totalorder %s162_s1, %s162_s1 }
  0x1e   :  { %v151_v13 = vadd.s32 8, %v146_v11  ;;  %p264_p10 = scmp.ne.s32.totalorder %s162_s1, %s263_s21  ;;  %p269_p12 = scmp.lt.s32.totalorder %s263_s21, %s263_s21 }
  0x20   :  { %vm152_vm1 = vcmp.eq.s32.totalorder %v150_v12, %v151_v13  ;;  %p270_p13 = por %p269_p12, %p268_p11 }
  0x22   :  { %p271_p0 = pnand %p270_p13, %p264_p10 }
  0x24   :  { %191 = vmatpush3.bf16.xpose.msra.mxu0 %v216_v2 }
  0x25   :  { %192 = vmatprep.subr.bf16.mxu0 %v293_v0 }
  0x2c   :  { %193 = vmatpush3.bf16.xpose.msra.mxu0 %v217_v3 }
  0x2d   :  { %194 = vmatprep.subr.bf16.mxu0 %v293_v0 }
  0x34   :  { %195 = vmatpush3.bf16.xpose.msra.mxu0 %v218_v4 }
  0x35   :  { %196 = vmatprep.subr.bf16.mxu0 %v293_v0 }
  0x3c   :  { %197 = vmatpush3.bf16.xpose.msra.mxu0 %v219_v5 }
  0x3d   :  { %198 = vmatprep.subr.bf16.mxu0 %v293_v0 }
  0x44   :  { %199 = vmatpush3.bf16.xpose.msra.mxu0 %v220_v6 }
  0x45   :  { %200 = vmatprep.subr.bf16.mxu0 %v293_v0 }
  0x4c   :  { %201 = vmatpush3.bf16.xpose.msra.mxu0 %v221_v7 }
  0x4d   :  { %202 = vmatprep.subr.bf16.mxu0 %v293_v0 }
  0x54   :  { %203 = vmatpush3.bf16.xpose.msra.mxu0 %v222_v8 }
  0x5b   :  { %205 = vmatmul.mubr.bf16.vlgmr.msra.gmra.mxu0 %v39_v9 }
 0x11b   :  { %v138_v14 = vpop.f32.mrf.mxu0 }
 0x11c   :  { %v153_v15 = vsel %vm152_vm1, -inf, %v138_v14 }
 0x11d   :  { %154 = vst [vmem:[#allocation7] sm:$0xff] %v153_v15  ;;  %v206_v16 = vpop.f32.mrf.mxu0 }
 0x11e   :  { %274 = shalt.err (!%p271_p0)
}
 0x11f   :  { %164 = dma.vmem_to_hbm [thread:$0]  %s162_s1, 128, %s322_s2, [#allocation4]   ;;  %v141_v17 = vpop.f32.mrf.mxu0 }
 0x121   :  { %v207_v18 = vpop.f32.mrf.mxu0 }
 0x122   :  { %287 = dma.done.wait [#allocation4], 128  }
 0x123   :  { %288 = vsyncadd [#allocation4], 4294967168 }
 0x124   :  { %168 = vsyncpa [#allocation3], 1 }
 0x125   :  { %169 = vsyncpa [#allocation6], 1 }
 0x126   :  { %170 = vsyncpa [#allocation4], 1 }

</bundles_post_ra>
